<compile_context>
chip_gen: v7x
topology: tpu7x:2x2x1
jax: 0.10.0
libtpu: 0.0.40
codegen_flags: <defaults>
</compile_context>

<pallas_src>
import functools

import numpy as np

import jax
import jax.numpy as jnp
from jax.experimental import pallas as pl
from jax.experimental.pallas import tpu as pltpu


# --------------------------------------------------------------------------
# Kernels
# --------------------------------------------------------------------------
def _interleave_kernel(x_ref, r_ref, o_ref, *, scale, out_row_w):
    """Wide-W path: x (rt, W) @ R (W, s*W) -> z; store z `scale` times.

    o_ref block is (rt, s*s*W); the `scale` copies of the interleaved row are
    adjacent in NCHW output memory, so each copy is a direct, lane-dense slice
    store (no concatenated temporary).
    """
    x = x_ref[...].astype(r_ref.dtype)
    z = jnp.dot(x, r_ref[...], preferred_element_type=jnp.float32)
    z = z.astype(o_ref.dtype)                      # (rt, s*W)
    for k in range(scale):                         # static, unrolled
        o_ref[:, k * out_row_w:(k + 1) * out_row_w] = z


def _folded_kernel(x_ref, r_ref, o_ref):
    """Small-W path: g input rows folded per kernel row.

    R (g*W, g*s*s*W) encodes interleave + H-replication for the whole folded
    row, so a single >=128-lane-wide store covers the output block.
    """
    x = x_ref[...].astype(r_ref.dtype)
    o_ref[...] = jnp.dot(x, r_ref[...],
                         preferred_element_type=jnp.float32).astype(o_ref.dtype)


# --------------------------------------------------------------------------
# Wrapper
# --------------------------------------------------------------------------
def _vmem_budget_bytes():
    """(tile budget, vmem_limit_bytes) derived from the actual chip generation."""
    try:
        cap = int(pltpu.get_tpu_info().vmem_capacity_bytes)
        if not cap or cap <= 0:
            cap = 64 * 1024 * 1024
    except Exception:
        cap = 64 * 1024 * 1024          # safe fallback (v7x-sized)
    return int(cap * 0.70), int(cap * 0.85)


def upsample_nearest(x_nchw, scale_factor=2, *, _row_tile_cap=None):
    """Semantics of nn.Upsample(scale_factor, mode='nearest') on NCHW input."""
    if x_nchw.ndim != 4:
        raise ValueError("upsample_nearest expects a 4D NCHW tensor")
    s = int(scale_factor)
    if s != scale_factor or s < 1:
        # TODO(synk): fractional nearest scales (floor(dst/scale) indexing) and
        # per-axis tuple scale factors are not implemented.
        raise NotImplementedError("only positive integer scale_factor supported")
    if s == 1:
        return x_nchw                    # avoid a pointless HBM round trip

    N, C, H, W = (int(d) for d in x_nchw.shape)
    rows = N * C * H
    dtype = x_nchw.dtype
    itemsize = jnp.dtype(dtype).itemsize
    # Sublane packing multiple: 8 for 4-byte, 16 for 2-byte, 32 for 1-byte dtypes.
    sub = max(8, 32 // max(itemsize, 1))
    # Compute dtype for the one-hot matmul (exact for floats; ints via f32).
    cdt = dtype if jnp.issubdtype(dtype, jnp.floating) else jnp.float32
    # TODO(synk): integer inputs are routed through f32 (exact only for |x| < 2**24).

    tile_budget, vmem_limit = _vmem_budget_bytes()

    # One-hot interleave matrix: I[w, s*w + k] = 1  -> (x @ I)[j] = x[j // s].
    interleave = np.kron(np.eye(W), np.ones((1, s)))            # (W, s*W)

    if s * W >= 128:
        # Wide path: interleave on MXU, H-copies as s lane-dense slice stores.
        g = 1
        r_np = interleave                                        # (W, s*W)
        kernel = functools.partial(_interleave_kernel, scale=s, out_row_w=s * W)
    else:
        # Small-W path: fold g input rows per kernel row so the single output
        # store is >= 128 lanes (avoids masked partial stores).
        g = 1
        want = -(-128 // (s * s * W))                            # ceil(128 / (s^2 W))
        for cand in range(want, min(rows, want * 64) + 1):
            if rows % cand == 0:
                g = cand
                break
        m = np.tile(interleave, (1, s))                          # (W, s*s*W)
        r_np = np.kron(np.eye(g), m)                             # (g*W, g*s*s*W)
        kernel = _folded_kernel

    w_in = g * W
    w_out = g * s * s * W
    n_rows_k = rows // g

    r_mat = jnp.asarray(r_np, dtype=cdt)
    r_bytes = int(r_mat.size) * jnp.dtype(cdt).itemsize
    # TODO(synk): extremely wide feature maps (W in the thousands) would need an
    # extra output-width grid axis to keep the expansion matrix in VMEM.

    # Scale-aware row tile: double-buffered (input + s^2-larger output) blocks
    # plus f32 matmul-result headroom, within the generation-aware budget.
    per_row = 2 * (w_in + w_out) * itemsize + 4 * w_out
    avail = max(tile_budget - 2 * r_bytes, per_row * sub)
    rt = max(sub, (avail // per_row) // sub * sub)
    if _row_tile_cap is not None:                   # test hook: force multi-step grid
        rt = min(rt, max(sub, (int(_row_tile_cap) // sub) * sub))
    if rt >= n_rows_k:
        rt = n_rows_k                               # single full-extent block

    grid = (pl.cdiv(n_rows_k, rt),)

    # Free, contiguous reshape: folded rows on sublanes, (folded) W on lanes.
    x2 = x_nchw.reshape(n_rows_k, w_in)

    cost = pl.CostEstimate(
        flops=2 * n_rows_k * int(r_np.shape[0]) * int(r_np.shape[1]),
        transcendentals=0,
        bytes_accessed=(1 + s * s) * rows * W * itemsize + r_bytes,
    )

    out2 = pl.pallas_call(
        kernel,
        out_shape=jax.ShapeDtypeStruct((n_rows_k, w_out), dtype),
        grid=grid,
        in_specs=[
            pl.BlockSpec((rt, w_in), lambda i: (i, 0)),
            # Constant block index -> expansion matrix stays resident in VMEM.
            pl.BlockSpec(tuple(int(d) for d in r_np.shape), lambda i: (0, 0)),
        ],
        out_specs=pl.BlockSpec((rt, w_out), lambda i: (i, 0)),
        compiler_params=pltpu.CompilerParams(
            dimension_semantics=("parallel",),      # megacore sharding on v7x
            vmem_limit_bytes=vmem_limit,
        ),
        cost_estimate=cost,
    )(x2, r_mat)

    # Free, contiguous reshape back to the PyTorch NCHW convention.
    return out2.reshape(N, C, s * H, s * W)


class Upsample:
    """Mirror of the PyTorch module: Upsample(scale_factor=2, mode='nearest')."""

    def __init__(self, scale_factor=2, mode="nearest"):
        if mode != "nearest":
            # TODO(synk): bilinear/bicubic modes are not implemented in Pallas.
            raise NotImplementedError("only mode='nearest' is supported")
        self.scale_factor = scale_factor

    def __call__(self, x):
        return upsample_nearest(x, self.scale_factor)


# --------------------------------------------------------------------------
# Self-test
# --------------------------------------------------------------------------
if __name__ == "__main__":
    def _ref(x, s):
        return jnp.repeat(jnp.repeat(x, s, axis=2), s, axis=3)

    # Main case (matches the module's typical use): small feature map, scale 2.
    key = jax.random.PRNGKey(0)
    x = jax.random.normal(key, (2, 4, 16, 16), dtype=jnp.float32)   # NCHW
    mod = Upsample(scale_factor=2, mode="nearest")
    y = jax.block_until_ready(mod(x))
    assert y.shape == (2, 4, 32, 32), y.shape
    assert y.dtype == x.dtype
    assert jnp.allclose(y, _ref(x, 2)), "mismatch vs reference nearest upsample"

    # Wide-W (interleave + slice-store) path with a forced small row tile so the
    # grid has a ragged (masked) final block.
    x2 = jax.random.normal(jax.random.PRNGKey(1), (1, 2, 19, 64), dtype=jnp.float32)
    y2 = jax.block_until_ready(upsample_nearest(x2, 2, _row_tile_cap=16))
    assert y2.shape == (1, 2, 38, 128)
    assert jnp.allclose(y2, _ref(x2, 2)), "mismatch on ragged-grid wide-W case"

    # Odd sizes and a non-default scale factor (folded small-W path).
    x3 = jax.random.normal(jax.random.PRNGKey(2), (1, 3, 5, 7), dtype=jnp.float32)
    y3 = jax.block_until_ready(upsample_nearest(x3, 3))
    assert y3.shape == (1, 3, 15, 21)
    assert jnp.allclose(y3, _ref(x3, 3)), "mismatch on odd-shape scale-3 case"

    print("KERNEL_OK")
</pallas_src>

<mosaic_0001>
module attributes {stable_mosaic.version = 11 : i64} {
  func.func @_folded_kernel(%arg0: i32, %arg1: memref<64x32xf32, #tpu.memory_space<vmem>>, %arg2: memref<32x128xf32, #tpu.memory_space<vmem>>, %arg3: memref<64x128xf32, #tpu.memory_space<vmem>>) attributes {dimension_semantics = [#tpu.dimension_semantics<parallel>], iteration_bounds = array<i64: 1>, scalar_prefetch = 0 : i64, scratch_operands = 0 : i64, tpu.core_type = #tpu.core_type<tc>, window_params = [{transform_indices = @transform_0, window_bounds = array<i64: 64, 32>}, {pipeline_mode = #tpu.pipeline_mode<synchronous>, transform_indices = @transform_1, window_bounds = array<i64: 32, 128>}, {transform_indices = @transform_2, window_bounds = array<i64: 64, 128>}]} {
    %c0 = arith.constant 0 : index
    %c0_0 = arith.constant 0 : index
    %0 = vector.load %arg1[%c0, %c0_0] : memref<64x32xf32, #tpu.memory_space<vmem>>, vector<64x32xf32>
    %c0_1 = arith.constant 0 : index
    %c0_2 = arith.constant 0 : index
    %1 = vector.load %arg2[%c0_1, %c0_2] : memref<32x128xf32, #tpu.memory_space<vmem>>, vector<32x128xf32>
    %cst = arith.constant dense<0.000000e+00> : vector<64x128xf32>
    %2 = tpu.matmul %0, %1, %cst {dimension_numbers = #tpu.dot_dimension_numbers<[1], [0], [0], [1], [0, 0, 1, 1], [], []>} : vector<64x32xf32>, vector<32x128xf32>, vector<64x128xf32> -> vector<64x128xf32>
    %c0_3 = arith.constant 0 : index
    %c0_4 = arith.constant 0 : index
    %3 = vector.load %arg3[%c0_3, %c0_4] : memref<64x128xf32, #tpu.memory_space<vmem>>, vector<64x128xf32>
    tpu.vector_store %arg3[%c0_3, %c0_4], %2 {strides = array<i32>} : memref<64x128xf32, #tpu.memory_space<vmem>>, vector<64x128xf32>,
    return
  }
  func.func @transform_0(%arg0: i32) -> (i32, i32) {
    %c0_i32 = arith.constant 0 : i32
    %c0_i32_0 = arith.constant 0 : i32
    return %arg0, %c0_i32 : i32, i32
  }
  func.func @transform_1(%arg0: i32) -> (i32, i32) {
    %c0_i32 = arith.constant 0 : i32
    %c0_i32_0 = arith.constant 0 : i32
    %c0_i32_1 = arith.constant 0 : i32
    return %c0_i32, %c0_i32_0 : i32, i32
  }
  func.func @transform_2(%arg0: i32) -> (i32, i32) {
    %c0_i32 = arith.constant 0 : i32
    %c0_i32_0 = arith.constant 0 : i32
    return %arg0, %c0_i32 : i32, i32
  }
}

</mosaic_0001>

<bundles_post_ra>
// kernel: tpu_custom_call.1
= control target key start
LH: loop header
LB: loop body
LE: loop exit
PB: predicated region body
PF: predicated region fallthrough
CT: control target
= control target key end

     0   :  { %vm24_vm0 = vcmask 261120   ;;  %s331_s0 = inlined_call_operand.vmem [shape: f32[64,32], index: 0, kind: input, shape index: {}]   ;;  %s332_s1 = inlined_call_operand.vmem [shape: f32[32,128], index: 1, kind: input, shape index: {}]   ;;  %s333_s2 = inlined_call_operand.hbm [shape: f32[64,128], index: 2, kind: output, shape index: {}]  }
   0x1   :  { %v20_v0 = vld [vmem:[%s332_s1] sm:$0xff]  ;;  %v21_v1 = vld [vmem:[%s332_s1 + $0x8] sm:$0xff]  ;;  %v22_v2 = vld [vmem:[%s332_s1 + $0x10] sm:$0xff] }
   0x2   :  { %v218_v3 = vpack.c.bf16 %v21_v1, %v20_v0  ;;  %v23_v4 = vld [vmem:[%s332_s1 + $0x18] sm:$0xff]  ;;  %v12_v5 = vld [vmem:[%s331_s0] sm:$0xff] }
   0x3   :  { %v16_v6 = vld [vmem:[%s331_s0 + $0x20] sm:$0xff]  ;;  %v222_v7 = vpack.c.bf16 %v23_v4, %v22_v2  ;;  %206 = vmatprep.mubr.msk.f32.mxu0 %vm24_vm0, %v12_v5 }
   0x4   :  { %212 = vmatprep.mubr.msk.f32.mxu1 %vm24_vm0, %v16_v6  ;;  %219 = vmatprep.subr.bf16.mxu0 %v218_v3 }
   0x5   :  { %226 = vmatprep.subr.bf16.mxu1 %v218_v3  ;;  %221 = vmatpush3.bf16.msra.mxu0 %v218_v3 }
   0x6   :  { %228 = vmatpush3.bf16.msra.mxu1 %v218_v3 }
   0x7   :  { %7 = vsyncpa [#allocation3], 0  ;;  %223 = vmatprep.subr.bf16.mxu0 %v222_v7  ;;  %227 = vmatprep.subr.bf16.mxu1 %v222_v7  ;;  %v13_v8 = vld [vmem:[%s331_s0 + $0x8] sm:$0xff]  ;;  %v14_v10 = vld [vmem:[%s331_s0 + $0x10] sm:$0xff]  ;;  %s257_s4 = smov [#allocation2]  }
   0x8   :  { %v17_v9 = vld [vmem:[%s331_s0 + $0x28] sm:$0xff]  ;;  %v18_v11 = vld [vmem:[%s331_s0 + $0x30] sm:$0xff]  ;;  %v15_v12 = vld [vmem:[%s331_s0 + $0x18] sm:$0xff]  ;;  %s167_s5 = sshll.u32 %s257_s4, 4  ;;  %s168_s5 = int_to_ptr.vmem [resolvable:$true] %s167_s5 }
   0x9   :  { %225 = vmatpush3.bf16.msra.mxu0 %v222_v7  ;;  %v19_v13 = vld [vmem:[%s331_s0 + $0x38] sm:$0xff]  ;;  %s233_s0 = scalar_lea.vmem %s168_s5, 1024  ;;  %p238_p1 = scmp.lt.s32.totalorder %s168_s5, %s168_s5 }
   0xa   :  { %229 = vmatpush3.bf16.msra.mxu1 %v222_v7  ;;  %p234_p0 = scmp.ne.s32.totalorder %s168_s5, %s233_s0  ;;  %p239_p2 = scmp.lt.s32.totalorder %s233_s0, %s233_s0 }
   0xc   :  { %207 = vmatmul.mubr.msk.f32.vlgmr.msra.gmra.mrb[0].mxu0 %vm24_vm0, %v13_v8  ;;  %p240_p3 = por %p239_p2, %p238_p1 }
   0xd   :  { %213 = vmatmul.mubr.msk.f32.vlgmr.msra.gmra.mrb[0].mxu1 %vm24_vm0, %v17_v9  ;;  %209 = vmatprep.mubr.msk.f32.mxu0 %vm24_vm0, %v14_v10 }
   0xe   :  { %215 = vmatprep.mubr.msk.f32.mxu1 %vm24_vm0, %v18_v11  ;;  %p241_p4 = pnand %p240_p3, %p234_p0 }
  0x10   :  { %210 = vmatmul.mubr.msk.f32.gmra.mrb[2].mxu0 %vm24_vm0, %v15_v12 }
  0x11   :  { %216 = vmatmul.mubr.msk.f32.gmra.mrb[2].mxu1 %vm24_vm0, %v19_v13 }
  0xdf   :  { %v208_v14 = vpop.f32.mrb[0].mxu0 }
  0xe0   :  { %v214_v15 = vpop.f32.mrb[0].mxu1  ;;  %155 = vst [vmem:[#allocation2 + $0x8] sm:$0xff] %v208_v14  ;;  %v115_v16 = vpop.f32.mrb[1].mxu0 }
  0xe1   :  { %159 = vst [vmem:[#allocation2 + $0x28] sm:$0xff] %v214_v15  ;;  %v135_v17 = vpop.f32.mrb[1].mxu1  ;;  %154 = vst [vmem:[#allocation2] sm:$0xff] %v115_v16 }
  0xe2   :  { %158 = vst [vmem:[#allocation2 + $0x20] sm:$0xff] %v135_v17 }
  0xe3   :  { %v211_v18 = vpop.f32.mrb[2].mxu0 }
  0xe4   :  { %v217_v19 = vpop.f32.mrb[2].mxu1  ;;  %157 = vst [vmem:[#allocation2 + $0x18] sm:$0xff] %v211_v18  ;;  %v125_v20 = vpop.f32.mrb[3].mxu0 }
  0xe5   :  { %161 = vst [vmem:[#allocation2 + $0x38] sm:$0xff] %v217_v19  ;;  %v145_v21 = vpop.f32.mrb[3].mxu1  ;;  %156 = vst [vmem:[#allocation2 + $0x10] sm:$0xff] %v125_v20 }
  0xe6   :  { %160 = vst [vmem:[#allocation2 + $0x30] sm:$0xff] %v145_v21 }
  0xe7   :  { %244 = shalt.err (!%p241_p4)
}
  0xe8   :  { %s245_s8 = scalar_lea.hbm %s333_s2, 1024 }
  0xe9   :  { %p246_p5 = scmp.ne.s32.totalorder %s333_s2, %s245_s8  ;;  %p249_p6 = scmp.lt.u32.totalorder %s245_s8, %s333_s2 }
  0xeb   :  { %p251_p7 = pnand %p249_p6, %p246_p5 }
  0xed   :  { %254 = shalt.err (!%p251_p7)
}
  0xee   :  { %s258_s13 = smov 128   ;;  %s259_s14 = smov 8  }
  0xef   :  { %173 = dma.vmem_to_hbm [thread:$0]  %s168_s5, 1024, %s333_s2, [#allocation3], %s258_s13, %s258_s13, %s259_s14  }
  0xf0   :  { %255 = dma.done.wait [#allocation3], 1024  }
  0xf1   :  { %256 = vsyncadd [#allocation3], 4294966272 }
  0xf2   :  { %177 = vsyncpa [#allocation3], 1 }

</bundles_post_ra>
